<compile_context>
chip_gen: v7x
topology: tpu7x:2x2x1
jax: 0.10.0
libtpu: 0.0.40
codegen_flags: <defaults>
</compile_context>

<pallas_src>
import functools

import jax
import jax.numpy as jnp
from jax import lax
from jax.experimental import pallas as pl
from jax.experimental.pallas import tpu as pltpu

_LANES = 128
_VMEM_LIMIT = 32 * 1024 * 1024   # explicit scoped-VMEM budget, safe on v5e/v6e/v7x


def _round_up(x, m):
    return (x + m - 1) // m * m


def _pick_l_tile(L, target=512):
    """Largest multiple-of-8 divisor of L that is <= target (fall back to full L)."""
    if L <= target or L % 8 != 0:
        return L
    t = (target // 8) * 8
    while t >= 8:
        if L % t == 0:
            return t
        t -= 8
    return L


# --------------------- pass 1: Conv1d + per-batch partial BN statistics ---------------------

def _conv_stats_kernel(x_ref, w_ref, b_ref, ypre_ref, stats_ref, xpad_scr, *, K, L, pad):
    # x_ref    : (L, Cin_p)          one batch element, NLC, channel-padded
    # w_ref    : (K, Cin_p, Cout_p)  tap-major conv weight
    # b_ref    : (1, Cout_p)         conv bias
    # ypre_ref : (L, Cout_p)         pre-BN conv output (f32)
    # stats_ref: (2, Cout_p)         row 0: sum over L, row 1: sum of squares over L
    # xpad_scr : (L + 2*pad, Cin_p)  VMEM scratch holding the "same"-padded tile
    cin = x_ref.shape[-1]

    # Build the L-padded tile in VMEM (zero halos + interior copy) -- padding handled
    # inside the kernel, no wrapper-side jnp.pad HBM round trip for L.
    if pad > 0:
        halo = jnp.zeros((pad, cin), dtype=x_ref.dtype)
        xpad_scr[0:pad, :] = halo
        xpad_scr[pad + L:pad + L + pad, :] = halo
    xpad_scr[pad:pad + L, :] = x_ref[...]

    # Conv1d (stride 1, same padding) as K tap matmuls on the MXU.  Slice the padded
    # *ref* per tap (no shifted value copies); no input upcast -- rely on
    # preferred_element_type for the f32 accumulator.
    acc = jnp.zeros(ypre_ref.shape, dtype=jnp.float32)
    for k in range(K):                                    # static unroll over taps
        acc = acc + jnp.dot(xpad_scr[k:k + L, :], w_ref[k],
                            preferred_element_type=jnp.float32)
    acc = acc + b_ref[...].astype(jnp.float32)            # broadcast bias over L

    ypre_ref[...] = acc
    stats_ref[...] = jnp.concatenate(
        [jnp.sum(acc, axis=0, keepdims=True),
         jnp.sum(acc * acc, axis=0, keepdims=True)], axis=0)


# --------------------- pass 2: BN apply + LeakyReLU + residual (streamed) -------------------

def _finalize_kernel(ypre_ref, scale_ref, shift_ref, *rest, neg_slope, residual):
    if residual:
        x_ref, out_ref = rest
    else:
        (out_ref,) = rest
    y = ypre_ref[...] * scale_ref[...] + shift_ref[...]   # BN folded into scale/shift
    y = jnp.where(y > 0, y, neg_slope * y)                # LeakyReLU(neg_slope)
    if residual:
        y = y + x_ref[...].astype(jnp.float32)
    out_ref[...] = y.astype(out_ref.dtype)


# --------------------------------------- wrapper --------------------------------------------

def conv_block(x_ncl, w_oik, b, gamma, beta, *, residual=True, eps=1e-5, neg_slope=0.2):
    """x_ncl: (N, Cin, L).  w_oik: (Cout, Cin, K) PyTorch Conv1d weight layout."""
    N, Cin, L = x_ncl.shape
    Cout, _, K = w_oik.shape
    assert K % 2 == 1, "ConvBlock uses 'same' padding; odd kernel_size expected"
    if residual:
        assert Cin == Cout, "residual requires in_features == out_features"
    pad = (K - 1) // 2
    Lp = L + 2 * pad
    cin_p = _round_up(Cin, _LANES)
    cout_p = _round_up(Cout, _LANES)

    # Glue: NCL -> NLC and lane-dense channel padding (single fused XLA copy per array).
    # TODO(synk): if the surrounding model produces/consumes NLC with >=128 channels,
    # these transposes/pads disappear entirely.
    x_nlc = jnp.pad(jnp.transpose(x_ncl, (0, 2, 1)),
                    ((0, 0), (0, 0), (0, cin_p - Cin)))                    # (N, L, Cin_p)
    w_kcd = jnp.pad(jnp.transpose(w_oik, (2, 1, 0)),
                    ((0, 0), (0, cin_p - Cin), (0, cout_p - Cout)))        # (K, Cin_p, Cout_p)
    b_p = jnp.pad(b, (0, cout_p - Cout)).reshape(1, cout_p).astype(jnp.float32)
    gamma_p = jnp.pad(gamma, (0, cout_p - Cout)).astype(jnp.float32)
    beta_p = jnp.pad(beta, (0, cout_p - Cout)).astype(jnp.float32)

    # ---- pass 1: conv + partial BN stats, grid over N ("parallel", pipelined) ----
    ypre, pstats = pl.pallas_call(
        functools.partial(_conv_stats_kernel, K=K, L=L, pad=pad),
        out_shape=(
            jax.ShapeDtypeStruct((N, L, cout_p), jnp.float32),
            jax.ShapeDtypeStruct((N, 2, cout_p), jnp.float32),
        ),
        grid=(N,),
        in_specs=[
            pl.BlockSpec((None, L, cin_p), lambda n: (n, 0, 0)),
            pl.BlockSpec((K, cin_p, cout_p), lambda n: (0, 0, 0)),
            pl.BlockSpec((1, cout_p), lambda n: (0, 0)),
        ],
        out_specs=(
            pl.BlockSpec((None, L, cout_p), lambda n: (n, 0, 0)),
            pl.BlockSpec((None, 2, cout_p), lambda n: (n, 0, 0)),
        ),
        scratch_shapes=[pltpu.VMEM((Lp, cin_p), x_nlc.dtype)],
        compiler_params=pltpu.CompilerParams(
            dimension_semantics=("parallel",),
            vmem_limit_bytes=_VMEM_LIMIT),
    )(x_nlc, w_kcd, b_p)

    # ---- tiny per-channel glue: fold training-mode batch statistics into scale/shift ----
    s = jnp.sum(pstats, axis=0)                            # (2, Cout_p)
    cnt = jnp.float32(N * L)
    mean = s[0] / cnt
    var = jnp.maximum(s[1] / cnt - mean * mean, 0.0)       # biased variance over (N, L)
    gscaled = gamma_p * lax.rsqrt(var + eps)
    scale = gscaled.reshape(1, cout_p)
    shift = (beta_p - mean * gscaled).reshape(1, cout_p)

    # ---- pass 2: BN apply + LeakyReLU + residual, tiled over (N, L), fully parallel ----
    tl = _pick_l_tile(L)
    in_specs = [
        pl.BlockSpec((None, tl, cout_p), lambda n, j: (n, j, 0)),
        pl.BlockSpec((1, cout_p), lambda n, j: (0, 0)),
        pl.BlockSpec((1, cout_p), lambda n, j: (0, 0)),
    ]
    args = [ypre, scale, shift]
    if residual:
        in_specs.append(pl.BlockSpec((None, tl, cin_p), lambda n, j: (n, j, 0)))
        args.append(x_nlc)

    out_nlc = pl.pallas_call(
        functools.partial(_finalize_kernel, neg_slope=neg_slope, residual=residual),
        out_shape=jax.ShapeDtypeStruct((N, L, cout_p), x_ncl.dtype),
        grid=(N, L // tl),
        in_specs=in_specs,
        out_specs=pl.BlockSpec((None, tl, cout_p), lambda n, j: (n, j, 0)),
        compiler_params=pltpu.CompilerParams(
            dimension_semantics=("parallel", "parallel"),
            vmem_limit_bytes=_VMEM_LIMIT),
    )(*args)

    # Strip lane padding, back to PyTorch NCL layout.
    return jnp.transpose(out_nlc[:, :, :Cout], (0, 2, 1))


# --------------------------------- pure-JAX reference ---------------------------------------

def conv_block_ref(x_ncl, w_oik, b, gamma, beta, *, residual=True, eps=1e-5, neg_slope=0.2):
    """Mirrors PyTorch Conv1d -> BatchNorm1d(training) -> LeakyReLU(0.2) [+ residual]."""
    K = w_oik.shape[-1]
    pad = (K - 1) // 2
    y = lax.conv_general_dilated(
        x_ncl, w_oik, window_strides=(1,), padding=[(pad, pad)],
        dimension_numbers=('NCH', 'OIH', 'NCH'))
    y = y + b[None, :, None]
    mean = jnp.mean(y, axis=(0, 2), keepdims=True)
    var = jnp.mean((y - mean) ** 2, axis=(0, 2), keepdims=True)
    y = (y - mean) * lax.rsqrt(var + eps)
    y = y * gamma[None, :, None] + beta[None, :, None]
    y = jnp.where(y > 0, y, neg_slope * y)
    return x_ncl + y if residual else y


if __name__ == "__main__":
    # Small shapes consistent with the module (residual => in_features == out_features).
    N, C, L, K = 2, 8, 16, 3

    key = jax.random.PRNGKey(0)
    kx, kw, kb, kg, kbe = jax.random.split(key, 5)
    x = jax.random.normal(kx, (N, C, L), dtype=jnp.float32)
    w = jax.random.normal(kw, (C, C, K), dtype=jnp.float32) * 0.3   # Conv1d weight (Cout,Cin,K)
    b = jax.random.normal(kb, (C,), dtype=jnp.float32) * 0.1        # Conv1d bias
    gamma = 1.0 + 0.1 * jax.random.normal(kg, (C,), dtype=jnp.float32)
    beta = 0.05 * jax.random.normal(kbe, (C,), dtype=jnp.float32)

    out = conv_block(x, w, b, gamma, beta, residual=True)
    out = jax.block_until_ready(out)

    ref = conv_block_ref(x, w, b, gamma, beta, residual=True)
    assert out.shape == (N, C, L)
    assert jnp.allclose(out, ref, atol=1e-4, rtol=1e-4), float(jnp.max(jnp.abs(out - ref)))

    print("KERNEL_OK")
</pallas_src>

<mosaic_0001>
module attributes {stable_mosaic.version = 11 : i64} {
  func.func @_conv_stats_kernel(%arg0: i32, %arg1: memref<1x16x128xf32, #tpu.memory_space<vmem>>, %arg2: memref<3x128x128xf32, #tpu.memory_space<vmem>>, %arg3: memref<1x128xf32, #tpu.memory_space<vmem>>, %arg4: memref<1x16x128xf32, #tpu.memory_space<vmem>>, %arg5: memref<1x2x128xf32, #tpu.memory_space<vmem>>, %arg6: memref<18x128xf32, #tpu.memory_space<vmem>>) attributes {dimension_semantics = [#tpu.dimension_semantics<parallel>], iteration_bounds = array<i64: 2>, scalar_prefetch = 0 : i64, scratch_operands = 1 : i64, tpu.core_type = #tpu.core_type<tc>, window_params = [{transform_indices = @transform_0, window_bounds = array<i64: 1, 16, 128>}, {pipeline_mode = #tpu.pipeline_mode<synchronous>, transform_indices = @transform_1, window_bounds = array<i64: 3, 128, 128>}, {pipeline_mode = #tpu.pipeline_mode<synchronous>, transform_indices = @transform_2, window_bounds = array<i64: 1, 128>}, {transform_indices = @transform_3, window_bounds = array<i64: 1, 16, 128>}, {transform_indices = @transform_4, window_bounds = array<i64: 1, 2, 128>}]} {
    %cst = arith.constant 0.000000e+00 : f32
    %0 = vector.broadcast %cst : f32 to vector<1x128xf32>
    %c0 = arith.constant 0 : index
    %c0_0 = arith.constant 0 : index
    %1 = vector.load %arg6[%c0, %c0_0] : memref<18x128xf32, #tpu.memory_space<vmem>>, vector<1x128xf32>
    tpu.vector_store %arg6[%c0, %c0_0], %0 {strides = array<i32>} : memref<18x128xf32, #tpu.memory_space<vmem>>, vector<1x128xf32>,
    %c17 = arith.constant 17 : index
    %c0_1 = arith.constant 0 : index
    %2 = vector.load %arg6[%c17, %c0_1] : memref<18x128xf32, #tpu.memory_space<vmem>>, vector<1x128xf32>
    tpu.vector_store %arg6[%c17, %c0_1], %0 {strides = array<i32>} : memref<18x128xf32, #tpu.memory_space<vmem>>, vector<1x128xf32>,
    %c0_2 = arith.constant 0 : index
    %c0_3 = arith.constant 0 : index
    %c0_4 = arith.constant 0 : index
    %3 = vector.load %arg1[%c0_2, %c0_3, %c0_4] : memref<1x16x128xf32, #tpu.memory_space<vmem>>, vector<1x16x128xf32>
    %4 = vector.shape_cast %3 : vector<1x16x128xf32> to vector<16x128xf32>
    %c1 = arith.constant 1 : index
    %c0_5 = arith.constant 0 : index
    %5 = vector.load %arg6[%c1, %c0_5] : memref<18x128xf32, #tpu.memory_space<vmem>>, vector<16x128xf32>
    tpu.vector_store %arg6[%c1, %c0_5], %4 {strides = array<i32>} : memref<18x128xf32, #tpu.memory_space<vmem>>, vector<16x128xf32>,
    %cst_6 = arith.constant 0.000000e+00 : f32
    %6 = vector.broadcast %cst_6 : f32 to vector<16x128xf32>
    %c0_7 = arith.constant 0 : index
    %c0_8 = arith.constant 0 : index
    %7 = vector.load %arg6[%c0_7, %c0_8] : memref<18x128xf32, #tpu.memory_space<vmem>>, vector<16x128xf32>
    %c0_9 = arith.constant 0 : index
    %c0_10 = arith.constant 0 : index
    %c0_11 = arith.constant 0 : index
    %8 = vector.load %arg2[%c0_9, %c0_10, %c0_11] : memref<3x128x128xf32, #tpu.memory_space<vmem>>, vector<1x128x128xf32>
    %9 = vector.shape_cast %8 : vector<1x128x128xf32> to vector<128x128xf32>
    %cst_12 = arith.constant dense<0.000000e+00> : vector<16x128xf32>
    %10 = tpu.matmul %7, %9, %cst_12 {dimension_numbers = #tpu.dot_dimension_numbers<[1], [0], [0], [1], [0, 0, 1, 1], [], []>} : vector<16x128xf32>, vector<128x128xf32>, vector<16x128xf32> -> vector<16x128xf32>
    %11 = arith.addf %6, %10 : vector<16x128xf32>
    %c1_13 = arith.constant 1 : index
    %c0_14 = arith.constant 0 : index
    %12 = vector.load %arg6[%c1_13, %c0_14] : memref<18x128xf32, #tpu.memory_space<vmem>>, vector<16x128xf32>
    %c1_15 = arith.constant 1 : index
    %c0_16 = arith.constant 0 : index
    %c0_17 = arith.constant 0 : index
    %13 = vector.load %arg2[%c1_15, %c0_16, %c0_17] : memref<3x128x128xf32, #tpu.memory_space<vmem>>, vector<1x128x128xf32>
    %14 = vector.shape_cast %13 : vector<1x128x128xf32> to vector<128x128xf32>
    %cst_18 = arith.constant dense<0.000000e+00> : vector<16x128xf32>
    %15 = tpu.matmul %12, %14, %cst_18 {dimension_numbers = #tpu.dot_dimension_numbers<[1], [0], [0], [1], [0, 0, 1, 1], [], []>} : vector<16x128xf32>, vector<128x128xf32>, vector<16x128xf32> -> vector<16x128xf32>
    %16 = arith.addf %11, %15 : vector<16x128xf32>
    %c2 = arith.constant 2 : index
    %c0_19 = arith.constant 0 : index
    %17 = vector.load %arg6[%c2, %c0_19] : memref<18x128xf32, #tpu.memory_space<vmem>>, vector<16x128xf32>
    %c2_20 = arith.constant 2 : index
    %c0_21 = arith.constant 0 : index
    %c0_22 = arith.constant 0 : index
    %18 = vector.load %arg2[%c2_20, %c0_21, %c0_22] : memref<3x128x128xf32, #tpu.memory_space<vmem>>, vector<1x128x128xf32>
    %19 = vector.shape_cast %18 : vector<1x128x128xf32> to vector<128x128xf32>
    %cst_23 = arith.constant dense<0.000000e+00> : vector<16x128xf32>
    %20 = tpu.matmul %17, %19, %cst_23 {dimension_numbers = #tpu.dot_dimension_numbers<[1], [0], [0], [1], [0, 0, 1, 1], [], []>} : vector<16x128xf32>, vector<128x128xf32>, vector<16x128xf32> -> vector<16x128xf32>
    %21 = arith.addf %16, %20 : vector<16x128xf32>
    %c0_24 = arith.constant 0 : index
    %c0_25 = arith.constant 0 : index
    %22 = vector.load %arg3[%c0_24, %c0_25] : memref<1x128xf32, #tpu.memory_space<vmem>>, vector<1x128xf32>
    %23 = vector.broadcast %22 : vector<1x128xf32> to vector<16x128xf32>
    %24 = arith.addf %21, %23 : vector<16x128xf32>
    %c0_26 = arith.constant 0 : index
    %c0_27 = arith.constant 0 : index
    %c0_28 = arith.constant 0 : index
    %25 = vector.load %arg4[%c0_26, %c0_27, %c0_28] : memref<1x16x128xf32, #tpu.memory_space<vmem>>, vector<1x16x128xf32>
    %26 = vector.shape_cast %25 : vector<1x16x128xf32> to vector<16x128xf32>
    %27 = vector.shape_cast %24 : vector<16x128xf32> to vector<1x16x128xf32>
    tpu.vector_store %arg4[%c0_26, %c0_27, %c0_28], %27 {strides = array<i32>} : memref<1x16x128xf32, #tpu.memory_space<vmem>>, vector<1x16x128xf32>,
    %cst_29 = arith.constant dense<0.000000e+00> : vector<128xf32>
    %28 = vector.multi_reduction <add>, %24, %cst_29 [0] : vector<16x128xf32> to vector<128xf32>
    %29 = vector.shape_cast %28 : vector<128xf32> to vector<1x128xf32>
    %30 = arith.mulf %24, %24 : vector<16x128xf32>
    %cst_30 = arith.constant dense<0.000000e+00> : vector<128xf32>
    %31 = vector.multi_reduction <add>, %30, %cst_30 [0] : vector<16x128xf32> to vector<128xf32>
    %32 = vector.shape_cast %31 : vector<128xf32> to vector<1x128xf32>
    %33 = tpu.concatenate %29, %32 in 0 : vector<1x128xf32>, vector<1x128xf32> -> vector<2x128xf32>
    %c0_31 = arith.constant 0 : index
    %c0_32 = arith.constant 0 : index
    %c0_33 = arith.constant 0 : index
    %34 = vector.load %arg5[%c0_31, %c0_32, %c0_33] : memref<1x2x128xf32, #tpu.memory_space<vmem>>, vector<1x2x128xf32>
    %35 = vector.shape_cast %34 : vector<1x2x128xf32> to vector<2x128xf32>
    %36 = vector.shape_cast %33 : vector<2x128xf32> to vector<1x2x128xf32>
    tpu.vector_store %arg5[%c0_31, %c0_32, %c0_33], %36 {strides = array<i32>} : memref<1x2x128xf32, #tpu.memory_space<vmem>>, vector<1x2x128xf32>,
    return
  }
  func.func @transform_0(%arg0: i32) -> (i32, i32, i32) {
    %c0_i32 = arith.constant 0 : i32
    %c0_i32_0 = arith.constant 0 : i32
    %c0_i32_1 = arith.constant 0 : i32
    return %arg0, %c0_i32, %c0_i32_0 : i32, i32, i32
  }
  func.func @transform_1(%arg0: i32) -> (i32, i32, i32) {
    %c0_i32 = arith.constant 0 : i32
    %c0_i32_0 = arith.constant 0 : i32
    %c0_i32_1 = arith.constant 0 : i32
    %c0_i32_2 = arith.constant 0 : i32
    return %c0_i32, %c0_i32_0, %c0_i32_1 : i32, i32, i32
  }
  func.func @transform_2(%arg0: i32) -> (i32, i32) {
    %c0_i32 = arith.constant 0 : i32
    %c0_i32_0 = arith.constant 0 : i32
    %c0_i32_1 = arith.constant 0 : i32
    return %c0_i32, %c0_i32_0 : i32, i32
  }
  func.func @transform_3(%arg0: i32) -> (i32, i32, i32) {
    %c0_i32 = arith.constant 0 : i32
    %c0_i32_0 = arith.constant 0 : i32
    %c0_i32_1 = arith.constant 0 : i32
    return %arg0, %c0_i32, %c0_i32_0 : i32, i32, i32
  }
  func.func @transform_4(%arg0: i32) -> (i32, i32, i32) {
    %c0_i32 = arith.constant 0 : i32
    %c0_i32_0 = arith.constant 0 : i32
    %c0_i32_1 = arith.constant 0 : i32
    return %arg0, %c0_i32, %c0_i32_0 : i32, i32, i32
  }
}

</mosaic_0001>

<bundles_post_ra>
// kernel: tpu_custom_call.1
= control target key start
LH: loop header
LB: loop body
LE: loop exit
PB: predicated region body
PF: predicated region fallthrough
CT: control target
= control target key end

     0   :  { %10 = vsyncpa [#allocation4], 0  ;;  %s1501_s0 = inlined_call_operand.hbm [shape: f32[2,16,128], index: 0, kind: input, shape index: {}]   ;;  %s1502_s1 = inlined_call_operand.hbm [shape: f32[3,128,128], index: 1, kind: input, shape index: {}]   ;;  %s1503_s2 = inlined_call_operand.vmem [shape: f32[1,128], index: 2, kind: input, shape index: {}]   ;;  %s1504_s3 = inlined_call_operand.hbm [shape: f32[2,16,128], index: 3, kind: output, shape index: {0}]   ;;  %s1505_s4 = inlined_call_operand.hbm [shape: f32[2,2,128], index: 4, kind: output, shape index: {1}]  }
   0x1   :  { %12 = vsyncpa [#allocation4 + $0x1], 0 }
   0x2   :  { %13 = vsyncpa [#allocation7], 0 }
   0x3   :  { %14 = vsyncpa [#allocation5], 0 }
   0x4   :  { %16 = vsyncpa [#allocation5 + $0x1], 0 }
   0x5   :  { %17 = vsyncpa [#allocation10], 0 }
   0x6   :  { %19 = vsyncpa [#allocation10 + $0x1], 0  ;;  %s1252_s15 = smov 0   ;;  %s1254_s16 = smov 0  }
   0x7   :  { %s1256_s17 = smov 0   ;;  %s1258_s18 = smov 0  }
   0x8 LB: > { %s1273_s19 = sadd.s32 4294967295, %s1216_s18   ;;  %s708_s20 = sadd.s32 4294967294, %s1216_s18   ;;  %s1216_s18 = sphi %s1258_s18, %s1525_s18   ;;  %s1212_s17 = sphi %s1256_s17, %s1524_s17   ;;  %s1208_s16 = sphi %s1254_s16, %s1523_s16   ;;  %s1204_s15 = sphi %s1252_s15, %s1522_s15  }
   0x9   : > { %p45_p0 = scmp.ne.s32.totalorder %s1208_s16, %s1204_s15  ;;  %p1506_p1 = scmp.eq.s32.totalorder %s1273_s19, 0 }
   0xa   : > { %p117_p3 = scmp.eq.s32.totalorder %s708_s20, 1  ;;  %p709_p5 = scmp.ge.s32.totalorder %s1216_s18, 1 }
   0xb   : > { %p1282_p4 = por %p1506_p1, %p45_p0  ;;  %p150_p7 = scmp.lt.s32.totalorder %s1216_s18, 3 }
   0xc   : > { %p1287_p6 = por %p117_p3, %p45_p0  ;;  %s1218_s24 = smov [#allocation6]  }
   0xd   : > { %s1509_s21 = scalar_select %p1282_p4, 1, 0 }
   0xe   : > { %s1510_s22 = scalar_select %p1287_p6, 1, 0 }
   0xf   : > { %p1292_p8 = pnand %p709_p5, %p150_p7  ;;  %s162_s25 = sshll.u32 %s1218_s24, 4  ;;  %s1296_s25 = int_to_ptr.vmem [resolvable:$true] %s162_s25 }
  0x10   : > { %s1308_s27 = sadd.s32 1, %s1216_s18   ;;  %s32_s28 = sadd.s32 1, %s1212_s17 }
  0x11   : > { %s1511_s23 = scalar_select %p1292_p8, 1, 0 }
  0x12   : > { %p999_p9 = pneg %p1292_p8  ;;  %s29_s29 = ssub.s32 %s1216_s18, %s1308_s27 }
  0x13   : > { %s1056_s6 = scalar_lea.hbm %s1502_s1, 6144 }
  0x14   : > { %p1303_p11 = pnand %p999_p9, %p1506_p1  ;;  %p1057_p12 = scmp.ne.s32.totalorder %s1502_s1, %s1056_s6 }
  0x15   : > { %p1063_p5 = scmp.lt.u32.totalorder %s1056_s6, %s1502_s1 }
  0x16   : > { %p1058_p13 = pneg %p1303_p11 }
  0x18   : > { %p1059_p0 = pnand %p1058_p13, %p1057_p12 }
  0x1a   : > { %p1060_p3 = pneg %p1059_p0 }
  0x1c   : > { %p1065_p7 = pnand %p1063_p5, %p1060_p3 }
  0x1e   : > { %1068 = shalt.err (!%p1065_p7)
}
  0x1f   : > { %s1069_s11 = scalar_lea.vmem %s1296_s25, 6144  ;;  %p1077_p2 = scmp.lt.s32.totalorder %s1296_s25, %s1296_s25 }
  0x20   : > { %p1070_p9 = scmp.ne.s32.totalorder %s1296_s25, %s1069_s11  ;;  %p1078_p6 = scmp.lt.s32.totalorder %s1069_s11, %s1069_s11 }
  0x22   : > { %p1072_p10 = pnand %p1070_p9, %p1058_p13  ;;  %p1079_p4 = por %p1078_p6, %p1077_p2 }
  0x24   : > { %p1073_p1 = pneg %p1072_p10 }
  0x26   : > { %p1080_p8 = pnand %p1079_p4, %p1073_p1 }
  0x28   : > { %1083 = shalt.err (!%p1080_p8)
}
  0x29   : > { %s1219_s12 = smov 128   ;;  %s1220_s13 = smov 8  }
  0x2a   : > { %1002 = dma.hbm_to_vmem [thread:$0]  (!%p1303_p11), %s1502_s1, 6144, %s1296_s25, [#allocation7], %s1219_s12, %s1219_s12, %s1220_s13  }
  0x2b   : > { %p30_p1 = scmp.eq.s32.totalorder %s29_s29, 0  ;;  %p39_p2 = scmp.ne.s32.totalorder %s1212_s17, %s1208_s16 }
  0x2c   : > { %p40_p4 = scmp.eq.s32.totalorder %s1216_s18, 0  ;;  %p1015_p6 = scmp.lt.s32.totalorder %s1216_s18, 2 }
  0x2d   : > { %s1342_s24 = scalar_select %p30_p1, %s1212_s17, %s32_s28  }
  0x2e   : > { %p41_p8 = por %p40_p4, %p39_p2  ;;  %p1513_p10 = scmp.eq.s32.totalorder %s1273_s19, 1 }
  0x2f   : > { %s179_s26 = sand.u32 1, %s1212_s17   ;;  %s728_s5 = sshll.u32 %s1216_s18, 8 }
  0x30   : > { %p1346_p12 = por %p1513_p10, %p39_p2  ;;  %s712_s6 = sshll.u32 %s179_s26, 4 }
  0x31   : > { %s1355_s9 = scalar_lea.hbm %s1501_s0, %s728_s5  ;;  %s183_s25 = scalar_lea.vmem [#allocation3], %s712_s6 }
  0x32   : > { %s190_s28 = sshll.u32 %s183_s25, 4  ;;  %p1357_p11 = pnand %p1015_p6, %p41_p8  ;;  %s1361_s28 = int_to_ptr.vmem [resolvable:$true] %s190_s28 }
  0x33   : > { %s1363_s10 = scalar_lea.sflag [#allocation4], %s179_s26  ;;  %s1084_s11 = scalar_lea.hbm %s1355_s9, 256 }
  0x34   : > { %p1085_p13 = scmp.ne.s32.totalorder %s1355_s9, %s1084_s11  ;;  %p1086_p0 = pneg %p1357_p11 }
  0x35   : > { %s1089_s5 = scalar_lea.hbm %s1501_s0, 512  ;;  %p1090_p7 = scmp.lt.u32.totalorder %s1355_s9, %s1501_s0 }
  0x36   : > { %p1087_p3 = pnand %p1086_p0, %p1085_p13  ;;  %p1091_p9 = scmp.lt.u32.totalorder %s1089_s5, %s1084_s11 }
  0x37   : > { %p1093_p2 = scmp.lt.u32.totalorder %s1084_s11, %s1355_s9 }
  0x38   : > { %p1088_p5 = pneg %p1087_p3  ;;  %p1092_p1 = por %p1091_p9, %p1090_p7 }
  0x3a   : > { %p1094_p4 = por %p1093_p2, %p1092_p1 }
  0x3c   : > { %p1095_p6 = pnand %p1094_p4, %p1088_p5 }
  0x3e   : > { %1098 = shalt.err (!%p1095_p6)
}
  0x3f   : > { %s1099_s26 = scalar_lea.vmem %s1361_s28, 256  ;;  %s1221_s8 = smov [#allocation3]  }
  0x40   : > { %p1100_p8 = scmp.ne.s32.totalorder %s1361_s28, %s1099_s26  ;;  %s1104_s25 = sshll.u32 %s1221_s8, 4  ;;  %s1105_s25 = int_to_ptr.vmem [resolvable:$false] %s1104_s25 }
  0x41   : > { %s1106_s14 = scalar_lea.vmem %s1105_s25, 512  ;;  %p1107_p3 = scmp.lt.s32.totalorder %s1361_s28, %s1105_s25 }
  0x42   : > { %p1102_p10 = pnand %p1100_p8, %p1086_p0  ;;  %p1108_p7 = scmp.lt.s32.totalorder %s1106_s14, %s1099_s26 }
  0x44   : > { %p1103_p13 = pneg %p1102_p10  ;;  %p1109_p9 = por %p1108_p7, %p1107_p3 }
  0x46   : > { %p1110_p1 = pnand %p1109_p9, %p1103_p13 }
  0x48   : > { %1113 = shalt.err (!%p1110_p1)
}
  0x49   : > { %1006 = dma.hbm_to_vmem [thread:$0]  (!%p1357_p11), %s1355_s9, 256, %s1361_s28, %s1363_s10, %s1219_s12, %s1219_s12, %s1220_s13  }
  0x4a   : > { %p1516_p0 = scmp.ne.s32.totalorder %s1511_s23, 0 }
  0x4b   : > { %s1397_s11 = sand.u32 (!%p1516_p0), 1, %s1208_s16   ;;  %p1517_p5 = scmp.ne.s32.totalorder (!%p1516_p0), %s1509_s21, 0 }
  0x4c   : > { %202 = sbr.rel (%p1516_p0) target bundleno = 413 (0x19d), region = 32  ;;  %s716_s20 = sshll.u32 (!%p1516_p0), %s1397_s11, 4 }
  0x4d   : > { %s205_s5 = scalar_lea.sflag (!%p1516_p0), [#allocation4], %s1397_s11  ;;  %s208_s29 = scalar_lea.vmem (!%p1516_p0), [#allocation3], %s716_s20 }
  0x53   : > { %1187 = dma.done.wait (%p1517_p5), %s205_s5, 256  }
  0x54   : > { %1189 = vsyncadd (%p1517_p5), %s205_s5, 4294967040  ;;  %p1518_p11 = scmp.eq.s32.totalorder %s1273_s19, 0 }
  0x56   : > { %1191 = dma.done.wait (%p1518_p11), [#allocation7], 6144   ;;  %p1519_p2 = pmov %p1518_p11 }
  0x57   : > { %v1222_v0 = vmov 0.0   ;;  %v250_v1 = vld [vmem:[#allocation6] sm:$0xff]  ;;  %v251_v2 = vld [vmem:[#allocation6 + $0x8] sm:$0xff]  ;;  %v252_v3 = vld [vmem:[#allocation6 + $0x10] sm:$0xff]  ;;  %s234_s21 = scalar_lea.vmem [#allocation8], %s716_s20  ;;  %s729_s9 = sshll.u32 %s1273_s19, 8 }
  0x58   : > { %1193 = vsyncadd (%p1519_p2), [#allocation7], 4294961152  ;;  %242 = vst [vmem:[#allocation2] sm:$0x1] %v1222_v0  ;;  %v921_v4 = vpack.c.bf16 %v251_v2, %v250_v1  ;;  %v253_v5 = vld [vmem:[#allocation6 + $0x18] sm:$0xff]  ;;  %v254_v7 = vld [vmem:[#allocation6 + $0x20] sm:$0xff]  ;;  %s1426_s6 = scalar_lea.hbm %s1504_s3, %s729_s9 }
  0x59   : > { %243 = vst [vmem:[#allocation2 + $0x11] sm:$0x1] %v1222_v0  ;;  %v925_v6 = vpack.c.bf16 %v253_v5, %v252_v3  ;;  %v255_v8 = vld [vmem:[#allocation6 + $0x28] sm:$0xff]  ;;  %v269_v10 = vld [vmem:[#allocation6 + $0x80] sm:$0xff]  ;;  %v256_v12 = vld [vmem:[#allocation6 + $0x30] sm:$0xff]  ;;  %s580_s23 = sshll.u32 %s234_s21, 4  ;;  %s1421_s23 = int_to_ptr.vmem [resolvable:$true] %s580_s23 }
  0x5a   : > { %922 = vmatprep.subr.bf16.mxu0 %v921_v4  ;;  %v929_v9 = vpack.c.bf16 %v255_v8, %v254_v7  ;;  %v270_v11 = vld [vmem:[#allocation6 + $0x88] sm:$0xff]  ;;  %v257_v13 = vld [vmem:[#allocation6 + $0x38] sm:$0xff]  ;;  %v244_v15 = vld [vmem:[%s208_s29] sm:$0xff]  ;;  %s562_s7 = scalar_lea.sflag [#allocation5], %s1397_s11  ;;  %s1114_s26 = scalar_lea.vmem %s1421_s23, 256 }
  0x5b   : > { %924 = vmatpush3.bf16.msra.mxu0 %v921_v4  ;;  %v889_v14 = vpack.c.bf16 %v270_v11, %v269_v10  ;;  %246 = vst [vmem:[#allocation2 + $0x1] sm:$0xff] %v244_v15  ;;  %v1411_v16 = vld [vmem:[%s208_s29 + $0x8] sm:$0xff]  ;;  %v271_v17 = vld [vmem:[#allocation6 + $0x90] sm:$0xff]  ;;  %816 = vmatprep.mubr.f32.mxu1 %v244_v15  ;;  %v273_v20 = vld [vmem:[#allocation6 + $0xa0] sm:$0xff]  ;;  %v933_v21 = vpack.c.bf16 %v257_v13, %v256_v12  ;;  %p1115_p4 = scmp.ne.s32.totalorder %s1421_s23, %s1114_s26  ;;  %s1223_s8 = smov [#allocation8]  }
  0x5c   : > { %926 = vmatprep.subr.bf16.mxu0 %v925_v6  ;;  %v272_v18 = vld [vmem:[#allocation6 + $0x98] sm:$0xff]  ;;  %247 = vst [vmem:[#allocation2 + $0x9] sm:$0xff] %v1411_v16  ;;  %v274_v22 = vld [vmem:[#allocation6 + $0xa8] sm:$0xff]  ;;  %v258_v23 = vld [vmem:[#allocation6 + $0x40] sm:$0xff]  ;;  %s1118_s25 = sshll.u32 %s1223_s8, 4  ;;  %s1119_s25 = int_to_ptr.vmem [resolvable:$false] %s1118_s25 }
  0x5d   : > { %890 = vmatprep.subr.bf16.mxu1 %v889_v14  ;;  %v893_v19 = vpack.c.bf16 %v272_v18, %v271_v17  ;;  %v259_v24 = vld [vmem:[#allocation6 + $0x48] sm:$0xff]  ;;  %v897_v25 = vpack.c.bf16 %v274_v22, %v273_v20  ;;  %v275_v26 = vld [vmem:[#allocation6 + $0xb0] sm:$0xff]  ;;  %v276_v27 = vld [vmem:[#allocation6 + $0xb8] sm:$0xff]  ;;  %p1116_p6 = pnand %p1115_p4, %p1346_p12  ;;  %s1120_s14 = scalar_lea.vmem %s1119_s25, 512 }
  0x5e   : > { %892 = vmatpush3.bf16.msra.mxu1 %v889_v14  ;;  %v937_v28 = vpack.c.bf16 %v259_v24, %v258_v23  ;;  %v260_v29 = vld [vmem:[#allocation6 + $0x50] sm:$0xff]  ;;  %v261_v30 = vld [vmem:[#allocation6 + $0x58] sm:$0xff]  ;;  %v901_v32 = vpack.c.bf16 %v276_v27, %v275_v26  ;;  %v277_v33 = vld [vmem:[#allocation6 + $0xc0] sm:$0xff]  ;;  %p1121_p10 = scmp.lt.s32.totalorder %s1421_s23, %s1119_s25  ;;  %p1122_p13 = scmp.lt.s32.totalorder %s1120_s14, %s1114_s26 }
  0x5f   : > { %928 = vmatpush3.bf16.msra.mxu0 %v925_v6  ;;  %894 = vmatprep.subr.bf16.mxu1 %v893_v19  ;;  %v278_v34 = vld [vmem:[#allocation6 + $0xc8] sm:$0xff]  ;;  %v941_v35 = vpack.c.bf16 %v261_v30, %v260_v29  ;;  %v262_v36 = vld [vmem:[#allocation6 + $0x60] sm:$0xff]  ;;  %v279_v39 = vld [vmem:[#allocation6 + $0xd0] sm:$0xff]  ;;  %p1117_p8 = pneg %p1116_p6 }
  0x60   : > { %930 = vmatprep.subr.bf16.mxu0 %v929_v9  ;;  %v263_v37 = vld [vmem:[#allocation6 + $0x68] sm:$0xff]  ;;  %v905_v38 = vpack.c.bf16 %v278_v34, %v277_v33  ;;  %v280_v40 = vld [vmem:[#allocation6 + $0xd8] sm:$0xff]  ;;  %v264_v42 = vld [vmem:[#allocation6 + $0x70] sm:$0xff]  ;;  %p1123_p3 = por %p1122_p13, %p1121_p10 }
  0x61   : > { %v945_v41 = vpack.c.bf16 %v263_v37, %v262_v36  ;;  %v265_v43 = vld [vmem:[#allocation6 + $0x78] sm:$0xff]  ;;  %v909_v44 = vpack.c.bf16 %v280_v40, %v279_v39  ;;  %v281_v45 = vld [vmem:[#allocation6 + $0xe0] sm:$0xff]  ;;  %v282_v46 = vld [vmem:[#allocation6 + $0xe8] sm:$0xff] }
  0x62   : > { %896 = vmatpush3.bf16.msra.mxu1 %v893_v19  ;;  %v248_v31 = vld [vmem:[#allocation2] sm:$0xff]  ;;  %v949_v47 = vpack.c.bf16 %v265_v43, %v264_v42  ;;  %v438_v48 = vld [vmem:[#allocation6 + $0x100] sm:$0xff]  ;;  %v913_v50 = vpack.c.bf16 %v282_v46, %v281_v45  ;;  %v283_v51 = vld [vmem:[#allocation6 + $0xf0] sm:$0xff]  ;;  %p1124_p7 = pnand %p1123_p3, %p1117_p8 }
  0x63   : > { %932 = vmatpush3.bf16.msra.mxu0 %v929_v9  ;;  %898 = vmatprep.subr.bf16.mxu1 %v897_v25  ;;  %v439_v49 = vld [vmem:[#allocation6 + $0x108] sm:$0xff]  ;;  %v284_v52 = vld [vmem:[#allocation6 + $0xf8] sm:$0xff]  ;;  %v440_v54 = vld [vmem:[#allocation6 + $0x110] sm:$0xff] }
  0x64   : > { %934 = vmatprep.subr.bf16.mxu0 %v933_v21  ;;  %851 = vmatprep.mubr.f32.mxu0 %v248_v31  ;;  %v953_v53 = vpack.c.bf16 %v439_v49, %v438_v48  ;;  %v441_v55 = vld [vmem:[#allocation6 + $0x118] sm:$0xff]  ;;  %v917_v56 = vpack.c.bf16 %v284_v52, %v283_v51  ;;  %v249_v57 = vld [vmem:[#allocation2 + $0x8] sm:$0xff]  ;;  %v442_v60 = vld [vmem:[#allocation6 + $0x120] sm:$0xff] }
  0x65   : > { %v957_v58 = vpack.c.bf16 %v441_v55, %v440_v54  ;;  %v435_v59 = vld [vmem:[#allocation2 + $0x2] sm:$0xff]  ;;  %v445_v0 = vld [vmem:[#allocation6 + $0x138] sm:$0xff]  ;;  %v446_v2 = vld [vmem:[#allocation6 + $0x140] sm:$0xff] }
  0x66   : > { %900 = vmatpush3.bf16.msra.mxu1 %v897_v25  ;;  %v443_v61 = vld [vmem:[#allocation6 + $0x128] sm:$0xff]  ;;  %v444_v63 = vld [vmem:[#allocation6 + $0x130] sm:$0xff]  ;;  %v449_v6 = vld [vmem:[#allocation6 + $0x158] sm:$0xff] }
  0x67   : > { %936 = vmatpush3.bf16.msra.mxu0 %v933_v21  ;;  %902 = vmatprep.subr.bf16.mxu1 %v901_v32  ;;  %v961_v62 = vpack.c.bf16 %v443_v61, %v442_v60  ;;  %v965_v1 = vpack.c.bf16 %v445_v0, %v444_v63  ;;  %v447_v3 = vld [vmem:[#allocation6 + $0x148] sm:$0xff]  ;;  %v448_v5 = vld [vmem:[#allocation6 + $0x150] sm:$0xff]  ;;  %v450_v8 = vld [vmem:[#allocation6 + $0x160] sm:$0xff] }
  0x68   : > { %938 = vmatprep.subr.bf16.mxu0 %v937_v28  ;;  %v969_v4 = vpack.c.bf16 %v447_v3, %v446_v2  ;;  %v973_v7 = vpack.c.bf16 %v449_v6, %v448_v5  ;;  %v451_v9 = vld [vmem:[#allocation6 + $0x168] sm:$0xff]  ;;  %v452_v11 = vld [vmem:[#allocation6 + $0x170] sm:$0xff]  ;;  %v453_v12 = vld [vmem:[#allocation6 + $0x178] sm:$0xff] }
  0x69   : > { %v977_v10 = vpack.c.bf16 %v451_v9, %v450_v8  ;;  %v981_v13 = vpack.c.bf16 %v453_v12, %v452_v11  ;;  %v436_v14 = vld [vmem:[#allocation2 + $0xa] sm:$0xff]  ;;  %v720_v18 = vld [vmem:[%s1503_s2] ss:$0 sm:$0xff] }
  0x6a   : > { %904 = vmatpush3.bf16.msra.mxu1 %v901_v32 }
  0x6b   : > { %940 = vmatpush3.bf16.msra.mxu0 %v937_v28  ;;  %906 = vmatprep.subr.bf16.mxu1 %v905_v38 }
  0x6c   : > { %942 = vmatprep.subr.bf16.mxu0 %v941_v35 }
  0x6e   : > { %908 = vmatpush3.bf16.msra.mxu1 %v905_v38 }
  0x6f   : > { %944 = vmatpush3.bf16.msra.mxu0 %v941_v35  ;;  %910 = vmatprep.subr.bf16.mxu1 %v909_v44 }
  0x70   : > { %946 = vmatprep.subr.bf16.mxu0 %v945_v41 }
  0x72   : > { %912 = vmatpush3.bf16.msra.mxu1 %v909_v44 }
  0x73   : > { %948 = vmatpush3.bf16.msra.mxu0 %v945_v41  ;;  %914 = vmatprep.subr.bf16.mxu1 %v913_v50 }
  0x74   : > { %950 = vmatprep.subr.bf16.mxu0 %v949_v47 }
  0x76   : > { %916 = vmatpush3.bf16.msra.mxu1 %v913_v50 }
  0x77   : > { %952 = vmatpush3.bf16.msra.mxu0 %v949_v47  ;;  %918 = vmatprep.subr.bf16.mxu1 %v917_v56 }
  0x78   : > { %954 = vmatprep.subr.bf16.mxu0 %v953_v53 }
  0x7a   : > { %852 = vmatmul.mubr.f32.vlgmr.msra.gmra.mrb[0].mxu0 %v249_v57  ;;  %920 = vmatpush3.bf16.msra.mxu1 %v917_v56 }
  0x7b   : > { %956 = vmatpush3.bf16.msra.mxu0 %v953_v53  ;;  %886 = vmatprep.mubr.f32.mxu0 %v435_v59 }
  0x7c   : > { %958 = vmatprep.subr.bf16.mxu0 %v957_v58 }
  0x7d   : > { %817 = vmatmul.mubr.f32.vlgmr.msra.gmra.mrb[0].mxu1 %v1411_v16 }
  0x7f   : > { %960 = vmatpush3.bf16.msra.mxu0 %v957_v58 }
  0x80   : > { %962 = vmatprep.subr.bf16.mxu0 %v961_v62 }
  0x83   : > { %964 = vmatpush3.bf16.msra.mxu0 %v961_v62 }
  0x84   : > { %966 = vmatprep.subr.bf16.mxu0 %v965_v1 }
  0x87   : > { %968 = vmatpush3.bf16.msra.mxu0 %v965_v1 }
  0x88   : > { %970 = vmatprep.subr.bf16.mxu0 %v969_v4 }
  0x8b   : > { %972 = vmatpush3.bf16.msra.mxu0 %v969_v4 }
  0x8c   : > { %974 = vmatprep.subr.bf16.mxu0 %v973_v7 }
  0x8f   : > { %976 = vmatpush3.bf16.msra.mxu0 %v973_v7 }
  0x90   : > { %978 = vmatprep.subr.bf16.mxu0 %v977_v10 }
  0x93   : > { %980 = vmatpush3.bf16.msra.mxu0 %v977_v10 }
  0x94   : > { %982 = vmatprep.subr.bf16.mxu0 %v981_v13 }
  0x97   : > { %984 = vmatpush3.bf16.msra.mxu0 %v981_v13 }
  0x9a   : > { %887 = vmatmul.mubr.f32.vlgmr.msra.gmra.mrb[0].mxu0 %v436_v14 }
 0x150   : > { %v818_v15 = vpop.f32.mrb[0].mxu1 }
 0x151   : > { %v351_v16 = vpop.f32.mrb[1].mxu1 }
 0x16d   : > { %v888_v17 = vpop.f32.mrb[0].mxu0 }
 0x16e   : > { %v985_v19 = vadd.f32 %v888_v17, %v818_v15  ;;  %v520_v20 = vpop.f32.mrb[1].mxu0 }
 0x16f   : > { %v986_v21 = vadd.f32 %v520_v20, %v351_v16 }
 0x170   : > { %v539_v22 = vadd.f32 %v985_v19, %v720_v18 }
 0x171   : > { %v538_v23 = vadd.f32 %v986_v21, %v720_v18 }
 0x172   : > { %541 = vst [vmem:[%s234_s21 + $0x8] sm:$0xff] %v539_v22  ;;  %v550_v24 = vmul.f32 %v539_v22, %v539_v22 }
 0x173   : > { %540 = vst [vmem:[%s234_s21] sm:$0xff] %v538_v23  ;;  %v542_v25 = vadd.f32 %v539_v22, %v538_v23  ;;  %v549_v26 = vmul.f32 %v538_v23, %v538_v23 }
 0x174   : > { %1127 = shalt.err (!%p1124_p7)
}
 0x175   : > { %s1128_s20 = scalar_lea.hbm %s1426_s6, 256  ;;  %s1132_s21 = scalar_lea.hbm %s1504_s3, 512 }
 0x176   : > { %p1129_p9 = scmp.ne.s32.totalorder %s1426_s6, %s1128_s20  ;;  %p1133_p5 = scmp.lt.u32.totalorder %s1426_s6, %s1504_s3 }
 0x177   : > { %p1134_p11 = scmp.lt.u32.totalorder %s1132_s21, %s1128_s20  ;;  %p1136_p4 = scmp.lt.u32.totalorder %s1128_s20, %s1426_s6 }
 0x178   : > { %p1130_p1 = pnand %p1129_p9, %p1346_p12 }
 0x179   : > { %p1135_p2 = por %p1134_p11, %p1133_p5 }
 0x17a   : > { %p1131_p0 = pneg %p1130_p1 }
 0x17b   : > { %p1137_p6 = por %p1136_p4, %p1135_p2 }
 0x17d   : > { %p1138_p8 = pnand %p1137_p6, %p1131_p0 }
 0x17f   : > { %1141 = shalt.err (!%p1138_p8)
}
 0x180   : > { %s1224_s9 = smov 128   ;;  %s1225_s28 = smov 8   ;;  %v543_v27 = vrot.slane %v542_v25, 4  ;;  %v551_v28 = vadd.f32 %v550_v24, %v549_v26  ;;  %vm558_vm0 = vcmask 1040384  }
 0x181   : > { %995 = dma.vmem_to_hbm [thread:$0]  (%p1346_p12), %s1421_s23, 256, %s1426_s6, %s562_s7, %s1224_s9, %s1224_s9, %s1225_s28  }
 0x182   : > { %v544_v29 = vadd.f32 %v543_v27, %v542_v25  ;;  %v552_v30 = vrot.slane %v551_v28, 4  ;;  %s719_s10 = sshll.u32 %s1397_s11, 1  ;;  %s725_s26 = sshll.u32 %s1273_s19, 5 }
 0x183   : > { %s241_s8 = scalar_lea.vmem [#allocation9], %s719_s10  ;;  %s1457_s7 = scalar_lea.hbm %s1505_s4, %s725_s26 }
 0x184   : > { %v545_v31 = vrot.slane %v544_v29, 2  ;;  %v553_v32 = vadd.f32 %v552_v30, %v551_v28  ;;  %s596_s25 = sshll.u32 %s241_s8, 4  ;;  %s567_s14 = scalar_lea.sflag [#allocation10], %s1397_s11  ;;  %s1459_s25 = int_to_ptr.vmem [resolvable:$true] %s596_s25 }
 0x185   : > { %s1142_s20 = scalar_lea.vmem %s1459_s25, 32  ;;  %s1226_s19 = smov [#allocation9]  }
 0x186   : > { %v546_v33 = vadd.f32 %v545_v31, %v544_v29  ;;  %v554_v34 = vrot.slane %v553_v32, 2  ;;  %p1143_p10 = scmp.ne.s32.totalorder %s1459_s25, %s1142_s20  ;;  %s1146_s5 = sshll.u32 %s1226_s19, 4  ;;  %s1147_s5 = int_to_ptr.vmem [resolvable:$false] %s1146_s5 }
 0x187   : > { %s1148_s29 = scalar_lea.vmem %s1147_s5, 64  ;;  %p1149_p7 = scmp.lt.s32.totalorder %s1459_s25, %s1147_s5 }
 0x188   : > { %v547_v35 = vrot.slane %v546_v33, 1  ;;  %v555_v36 = vadd.f32 %v554_v34, %v553_v32  ;;  %p1144_p13 = pnand %p1143_p10, %p1346_p12  ;;  %p1150_p9 = scmp.lt.s32.totalorder %s1148_s29, %s1142_s20 }
 0x18a   : > { %v556_v37 = vrot.slane %v555_v36, 1  ;;  %v548_v38 = vadd.f32 %v547_v35, %v546_v33  ;;  %p1145_p3 = pneg %p1144_p13  ;;  %p1151_p1 = por %p1150_p9, %p1149_p7 }
 0x18c   : > { %v557_v39 = vadd.f32 %v556_v37, %v555_v36  ;;  %p1152_p0 = pnand %p1151_p1, %p1145_p3 }
 0x18e   : > { %v559_v40 = vsel %vm558_vm0, %v548_v38, %v557_v39 }
 0x18f   : > { %560 = vst [vmem:[%s241_s8] sm:$0x3] %v559_v40 }
 0x190   : > { %1155 = shalt.err (!%p1152_p0)
}
 0x191   : > { %s1156_s11 = scalar_lea.hbm %s1457_s7, 32  ;;  %s1160_s13 = scalar_lea.hbm %s1505_s4, 64 }
 0x192   : > { %p1157_p5 = scmp.ne.s32.totalorder %s1457_s7, %s1156_s11  ;;  %p1161_p4 = scmp.lt.u32.totalorder %s1457_s7, %s1505_s4 }
 0x193   : > { %p1162_p6 = scmp.lt.u32.totalorder %s1160_s13, %s1156_s11  ;;  %p1164_p10 = scmp.lt.u32.totalorder %s1156_s11, %s1457_s7 }
 0x194   : > { %p1158_p11 = pnand %p1157_p5, %p1346_p12 }
 0x195   : > { %p1163_p8 = por %p1162_p6, %p1161_p4 }
 0x196   : > { %p1159_p2 = pneg %p1158_p11 }
 0x197   : > { %p1165_p13 = por %p1164_p10, %p1163_p8 }
 0x199   : > { %p1166_p3 = pnand %p1165_p13, %p1159_p2 }
 0x19b   : > { %1169 = shalt.err (!%p1166_p3)
}
 0x19c   : > { %996 = dma.vmem_to_hbm [thread:$0]  (%p1346_p12), %s1459_s25, 32, %s1457_s7, %s567_s14  }
 0x19d PF: > { %s608_s10 = sand.u32 1, %s1204_s15   ;;  %p1520_p7 = scmp.ne.s32.totalorder %s1510_s22, 0 }
 0x19e   : > { %p1521_p9 = scmp.ge.s32.totalorder %s1216_s18, 2  ;;  %s609_s26 = scalar_lea.sflag [#allocation5], %s608_s10 }
 0x1a0   : > { %p1008_p1 = pnand %p1521_p9, %p1520_p7 }
 0x1a2   : > { %1195 = dma.done.wait (!%p1008_p1), %s609_s26, 256  }
 0x1a3   : > { %1197 = vsyncadd (!%p1008_p1), %s609_s26, 4294967040  ;;  %s618_s8 = scalar_lea.sflag [#allocation10], %s608_s10 }
 0x1a4   : > { %1199 = dma.done.wait (!%p1008_p1), %s618_s8, 32  }
 0x1a5   : > { %1201 = vsyncadd (!%p1008_p1), %s618_s8, 4294967264  ;;  %p22_p12 = scmp.ge.s32.totalorder %s1308_s27, 4   ;;  %s1522_s15 = smov %s1208_s16 }
 0x1a6   : > { %s1523_s16 = smov %s1212_s17  ;;  %s1524_s17 = smov %s1342_s24 }
 0x1a7   : > { %s1525_s18 = smov %s1308_s27  ;;  %24 = sbr.rel (!%p22_p12) target bundleno = 8 (0x8), region = 100 }
 0x1ae   :  { %623 = vsyncpa [#allocation4], 1 }
 0x1af   :  { %625 = vsyncpa [#allocation4 + $0x1], 1 }
 0x1b0   :  { %626 = vsyncpa [#allocation7], 1 }
 0x1b1   :  { %627 = vsyncpa [#allocation5], 1 }
 0x1b2   :  { %629 = vsyncpa [#allocation5 + $0x1], 1 }
 0x1b3   :  { %630 = vsyncpa [#allocation10], 1 }
 0x1b4   :  { %632 = vsyncpa [#allocation10 + $0x1], 1 }

</bundles_post_ra>
